<compile_context>
chip_gen: v6e
topology: v6e:2x2x1
jax: 0.10.0
libtpu: 0.0.40
codegen_flags: <defaults>
</compile_context>

<pallas_src>
import functools

import jax
import jax.numpy as jnp
from jax.experimental import pallas as pl
from jax.experimental.pallas import tpu as pltpu


# ----------------------------- Pallas kernel ------------------------------- #

def _build_patches(img, mask, W, HW):
    """img: (C, HW) -> (9*C, HW) patches of a 3x3 'same' convolution.

    Row order is (kh*3+kw)-major / channel-minor, i.e. row = (kh*3 + kw) * C + c,
    matching weights laid out as transpose(w, (0, 2, 3, 1)).reshape(Cout, 9*C).
    Shifts are lane rolls (XLU); `mask` is the precomputed 0/1 boundary mask of
    shape (9*C, HW) applied with a single elementwise multiply.
    """
    pieces = []
    for kh in range(3):
        for kw in range(3):
            d = (kh - 1) * W + (kw - 1)
            shifted = img if d == 0 else pltpu.roll(img, shift=(-d) % HW, axis=1)
            pieces.append(shifted)
    return jnp.concatenate(pieces, axis=0) * mask       # (9*C, HW)


def _fused_kernel(x_ref, m1_ref, m2_ref, w1_ref, b1_ref, w2_ref, b2_ref, o_ref,
                  *, W, HW, Nb, Cout):
    m1 = m1_ref[...]                                     # (9*Cin_p, HW) grid-constant
    m2 = m2_ref[...]                                     # (9*Cout , HW) grid-constant

    # conv1 (3x3, pad 1) + bias + ReLU : one MXU matmul over all Nb samples.
    p1 = jnp.concatenate(
        [_build_patches(x_ref[i], m1, W, HW) for i in range(Nb)], axis=1)
    y1 = jnp.dot(w1_ref[...], p1, preferred_element_type=jnp.float32)
    y1 = jnp.maximum(y1 + b1_ref[...], 0.0)              # (Cout, Nb*HW)

    # conv2 (3x3, pad 1) + bias; conv1 activation stays on-chip.
    p2 = jnp.concatenate(
        [_build_patches(y1[:, i * HW:(i + 1) * HW], m2, W, HW) for i in range(Nb)],
        axis=1)
    y2 = jnp.dot(w2_ref[...], p2, preferred_element_type=jnp.float32) + b2_ref[...]

    # Per-sample LayerNorm over [Cout, H, W] (no affine) + ReLU, one-pass stats.
    inv_n = 1.0 / float(Cout * HW)
    for i in range(Nb):
        yi = y2[:, i * HW:(i + 1) * HW]
        mean = jnp.sum(yi) * inv_n
        var = jnp.sum(yi * yi) * inv_n - mean * mean      # E[x^2] - mean^2
        o_ref[i] = jnp.maximum((yi - mean) * jax.lax.rsqrt(var + 1e-5), 0.0)


# ------------------------------- glue (JAX) -------------------------------- #

def _make_boundary_mask(C, H, W):
    """(9*C, HW) 0/1 f32 mask; row (kh*3+kw)*C + c zeroes 'same'-padding taps."""
    hh = jnp.arange(H * W, dtype=jnp.int32) // W
    ww = jnp.arange(H * W, dtype=jnp.int32) % W
    rows = []
    for kh in range(3):
        for kw in range(3):
            dh, dw = kh - 1, kw - 1
            m = ((hh + dh >= 0) & (hh + dh < H) &
                 (ww + dw >= 0) & (ww + dw < W)).astype(jnp.float32)
            rows.append(jnp.broadcast_to(m[None, :], (C, H * W)))
    return jnp.concatenate(rows, axis=0)


def down_double_conv_ae(x, w1, b1, w2, b2):
    """Forward of DownDoubleConvAE. x: (N, Cin, H, W) f32 -> (N, Cout, H, W) f32."""
    N, Cin, H, W = x.shape
    Cout = w1.shape[0]
    HW = H * W

    # Pad input channels to a multiple of 8 so each (C, HW) f32 patch piece is
    # sublane-tile aligned.  Zero channels x zero weights = exact.
    Cin_p = ((Cin + 7) // 8) * 8
    if Cin_p != Cin:
        x = jnp.pad(x, ((0, 0), (0, Cin_p - Cin), (0, 0), (0, 0)))
        w1 = jnp.pad(w1, ((0, 0), (0, Cin_p - Cin), (0, 0), (0, 0)))

    # Batch grouping: keep >=2 grid steps when N>=2 (v7x dual-TC), amortize the
    # ~0.35us/step overhead for larger N by packing Nb samples per step.
    if N >= 2:
        Nb = min(pl.cdiv(N, 2), 8)
    else:
        Nb = 1
    G = pl.cdiv(N, Nb)
    N_pad = G * Nb
    if N_pad != N:
        x = jnp.pad(x, ((0, N_pad - N), (0, 0), (0, 0), (0, 0)))

    x_flat = x.reshape(N_pad, Cin_p, HW).astype(jnp.float32)   # NCHW-flat (free reshape)

    # Weight matrices (Cout, 9*C); column index = (kh*3+kw)*C + c (matches patch rows).
    w1m = jnp.transpose(w1, (0, 2, 3, 1)).reshape(Cout, 9 * Cin_p).astype(jnp.float32)
    w2m = jnp.transpose(w2, (0, 2, 3, 1)).reshape(Cout, 9 * Cout).astype(jnp.float32)
    b1c = b1.reshape(Cout, 1).astype(jnp.float32)
    b2c = b2.reshape(Cout, 1).astype(jnp.float32)

    # Precomputed grid-constant boundary masks (no per-step iota/compare work).
    m1 = _make_boundary_mask(Cin_p, H, W)                      # (9*Cin_p, HW)
    m2 = _make_boundary_mask(Cout, H, W)                       # (9*Cout , HW)

    kernel = functools.partial(_fused_kernel, W=W, HW=HW, Nb=Nb, Cout=Cout)

    cost = pl.CostEstimate(
        flops=2 * N_pad * HW * (Cout * 9 * Cin_p + Cout * 9 * Cout),
        transcendentals=N_pad,                                  # one rsqrt per sample
        bytes_accessed=4 * (x_flat.size + N_pad * Cout * HW + w1m.size + w2m.size
                            + m1.size + m2.size + 2 * Cout),
    )

    out_flat = pl.pallas_call(
        kernel,
        out_shape=jax.ShapeDtypeStruct((N_pad, Cout, HW), jnp.float32),
        grid=(G,),
        in_specs=[
            pl.BlockSpec((Nb, Cin_p, HW), lambda n: (n, 0, 0)),   # Nb images / step
            pl.BlockSpec((9 * Cin_p, HW), lambda n: (0, 0)),      # conv1 boundary mask
            pl.BlockSpec((9 * Cout, HW), lambda n: (0, 0)),       # conv2 boundary mask
            pl.BlockSpec((Cout, 9 * Cin_p), lambda n: (0, 0)),    # conv1 weights
            pl.BlockSpec((Cout, 1), lambda n: (0, 0)),            # conv1 bias column
            pl.BlockSpec((Cout, 9 * Cout), lambda n: (0, 0)),     # conv2 weights
            pl.BlockSpec((Cout, 1), lambda n: (0, 0)),            # conv2 bias column
        ],
        out_specs=pl.BlockSpec((Nb, Cout, HW), lambda n: (n, 0, 0)),
        compiler_params=pltpu.CompilerParams(dimension_semantics=("parallel",)),
        cost_estimate=cost,
    )(x_flat, m1, m2, w1m, b1c, w2m, b2c)

    # Output is already NCHW-flat: free reshape, drop batch padding.
    return out_flat[:N].reshape(N, Cout, H, W)


# ------------------------------ reference (JAX) ----------------------------- #

def _ref_forward(x, w1, b1, w2, b2):
    dn = ("NCHW", "OIHW", "NCHW")

    def conv(inp, w):
        return jax.lax.conv_general_dilated(
            inp, w, (1, 1), "SAME", dimension_numbers=dn,
            preferred_element_type=jnp.float32)

    y = jnp.maximum(conv(x, w1) + b1[None, :, None, None], 0.0)
    z = conv(y, w2) + b2[None, :, None, None]
    mean = z.mean(axis=(1, 2, 3), keepdims=True)
    var = ((z - mean) ** 2).mean(axis=(1, 2, 3), keepdims=True)
    return jnp.maximum((z - mean) * jax.lax.rsqrt(var + 1e-5), 0.0)


# ---------------------------------- main ------------------------------------ #

if __name__ == "__main__":
    N, Cin, Cout, S = 2, 4, 8, 16

    key = jax.random.PRNGKey(0)
    kx, k1, k2, k3, k4 = jax.random.split(key, 5)

    x = jax.random.normal(kx, (N, Cin, S, S), dtype=jnp.float32)

    # Deterministic parameter init (uniform in +/- 1/sqrt(fan_in), like PyTorch defaults).
    bnd1 = 1.0 / jnp.sqrt(Cin * 9.0)
    bnd2 = 1.0 / jnp.sqrt(Cout * 9.0)
    w1 = jax.random.uniform(k1, (Cout, Cin, 3, 3), jnp.float32, -bnd1, bnd1)
    b1 = jax.random.uniform(k2, (Cout,), jnp.float32, -bnd1, bnd1)
    w2 = jax.random.uniform(k3, (Cout, Cout, 3, 3), jnp.float32, -bnd2, bnd2)
    b2 = jax.random.uniform(k4, (Cout,), jnp.float32, -bnd2, bnd2)

    out = jax.block_until_ready(down_double_conv_ae(x, w1, b1, w2, b2))
    assert out.shape == (N, Cout, S, S), out.shape

    # Full-f32 MXU path -> tight tolerance vs the f32 XLA reference.
    ref = jax.block_until_ready(_ref_forward(x, w1, b1, w2, b2))
    assert bool(jnp.allclose(out, ref, atol=1e-4, rtol=1e-4)), \
        "mismatch vs f32 reference"

    print("KERNEL_OK")
</pallas_src>

<mosaic_0001>
module attributes {stable_mosaic.version = 11 : i64} {
  func.func @_fused_kernel(%arg0: i32, %arg1: memref<1x8x256xf32, #tpu.memory_space<vmem>>, %arg2: memref<72x256xf32, #tpu.memory_space<vmem>>, %arg3: memref<72x256xf32, #tpu.memory_space<vmem>>, %arg4: memref<8x72xf32, #tpu.memory_space<vmem>>, %arg5: memref<8x1xf32, #tpu.memory_space<vmem>>, %arg6: memref<8x72xf32, #tpu.memory_space<vmem>>, %arg7: memref<8x1xf32, #tpu.memory_space<vmem>>, %arg8: memref<1x8x256xf32, #tpu.memory_space<vmem>>) attributes {dimension_semantics = [#tpu.dimension_semantics<parallel>], iteration_bounds = array<i64: 2>, scalar_prefetch = 0 : i64, scratch_operands = 0 : i64, tpu.core_type = #tpu.core_type<tc>, window_params = [{transform_indices = @transform_0, window_bounds = array<i64: 1, 8, 256>}, {pipeline_mode = #tpu.pipeline_mode<synchronous>, transform_indices = @transform_1, window_bounds = array<i64: 72, 256>}, {pipeline_mode = #tpu.pipeline_mode<synchronous>, transform_indices = @transform_2, window_bounds = array<i64: 72, 256>}, {pipeline_mode = #tpu.pipeline_mode<synchronous>, transform_indices = @transform_3, window_bounds = array<i64: 8, 72>}, {pipeline_mode = #tpu.pipeline_mode<synchronous>, transform_indices = @transform_4, window_bounds = array<i64: 8, 1>}, {pipeline_mode = #tpu.pipeline_mode<synchronous>, transform_indices = @transform_5, window_bounds = array<i64: 8, 72>}, {pipeline_mode = #tpu.pipeline_mode<synchronous>, transform_indices = @transform_6, window_bounds = array<i64: 8, 1>}, {transform_indices = @transform_7, window_bounds = array<i64: 1, 8, 256>}]} {
    %c0 = arith.constant 0 : index
    %c0_0 = arith.constant 0 : index
    %0 = vector.load %arg2[%c0, %c0_0] : memref<72x256xf32, #tpu.memory_space<vmem>>, vector<72x256xf32>
    %c0_1 = arith.constant 0 : index
    %c0_2 = arith.constant 0 : index
    %1 = vector.load %arg3[%c0_1, %c0_2] : memref<72x256xf32, #tpu.memory_space<vmem>>, vector<72x256xf32>
    %c0_3 = arith.constant 0 : index
    %c0_4 = arith.constant 0 : index
    %c0_5 = arith.constant 0 : index
    %2 = vector.load %arg1[%c0_3, %c0_4, %c0_5] : memref<1x8x256xf32, #tpu.memory_space<vmem>>, vector<1x8x256xf32>
    %3 = vector.shape_cast %2 : vector<1x8x256xf32> to vector<8x256xf32>
    %c17_i32 = arith.constant 17 : i32
    %4 = tpu.dynamic_rotate %3 by %c17_i32 dim 1 : vector<8x256xf32>, i32 -> vector<8x256xf32>
    %c16_i32 = arith.constant 16 : i32
    %5 = tpu.dynamic_rotate %3 by %c16_i32 dim 1 : vector<8x256xf32>, i32 -> vector<8x256xf32>
    %c15_i32 = arith.constant 15 : i32
    %6 = tpu.dynamic_rotate %3 by %c15_i32 dim 1 : vector<8x256xf32>, i32 -> vector<8x256xf32>
    %c1_i32 = arith.constant 1 : i32
    %7 = tpu.dynamic_rotate %3 by %c1_i32 dim 1 : vector<8x256xf32>, i32 -> vector<8x256xf32>
    %c255_i32 = arith.constant 255 : i32
    %8 = tpu.dynamic_rotate %3 by %c255_i32 dim 1 : vector<8x256xf32>, i32 -> vector<8x256xf32>
    %c241_i32 = arith.constant 241 : i32
    %9 = tpu.dynamic_rotate %3 by %c241_i32 dim 1 : vector<8x256xf32>, i32 -> vector<8x256xf32>
    %c240_i32 = arith.constant 240 : i32
    %10 = tpu.dynamic_rotate %3 by %c240_i32 dim 1 : vector<8x256xf32>, i32 -> vector<8x256xf32>
    %c239_i32 = arith.constant 239 : i32
    %11 = tpu.dynamic_rotate %3 by %c239_i32 dim 1 : vector<8x256xf32>, i32 -> vector<8x256xf32>
    %12 = tpu.concatenate %4, %5, %6, %7, %3, %8, %9, %10, %11 in 0 : vector<8x256xf32>, vector<8x256xf32>, vector<8x256xf32>, vector<8x256xf32>, vector<8x256xf32>, vector<8x256xf32>, vector<8x256xf32>, vector<8x256xf32>, vector<8x256xf32> -> vector<72x256xf32>
    %13 = arith.mulf %12, %0 : vector<72x256xf32>
    %c0_6 = arith.constant 0 : index
    %c0_7 = arith.constant 0 : index
    %14 = vector.load %arg4[%c0_6, %c0_7] : memref<8x72xf32, #tpu.memory_space<vmem>>, vector<8x72xf32>
    %cst = arith.constant dense<0.000000e+00> : vector<8x256xf32>
    %15 = tpu.matmul %14, %13, %cst {dimension_numbers = #tpu.dot_dimension_numbers<[1], [0], [0], [1], [0, 0, 1, 1], [], []>} : vector<8x72xf32>, vector<72x256xf32>, vector<8x256xf32> -> vector<8x256xf32>
    %c0_8 = arith.constant 0 : index
    %c0_9 = arith.constant 0 : index
    %16 = vector.load %arg5[%c0_8, %c0_9] : memref<8x1xf32, #tpu.memory_space<vmem>>, vector<8x1xf32>
    %17 = vector.broadcast %16 : vector<8x1xf32> to vector<8x256xf32>
    %18 = arith.addf %15, %17 : vector<8x256xf32>
    %cst_10 = arith.constant 0.000000e+00 : f32
    %19 = vector.broadcast %cst_10 : f32 to vector<8x256xf32>
    %20 = arith.maximumf %18, %19 : vector<8x256xf32>
    %c17_i32_11 = arith.constant 17 : i32
    %21 = tpu.dynamic_rotate %20 by %c17_i32_11 dim 1 : vector<8x256xf32>, i32 -> vector<8x256xf32>
    %c16_i32_12 = arith.constant 16 : i32
    %22 = tpu.dynamic_rotate %20 by %c16_i32_12 dim 1 : vector<8x256xf32>, i32 -> vector<8x256xf32>
    %c15_i32_13 = arith.constant 15 : i32
    %23 = tpu.dynamic_rotate %20 by %c15_i32_13 dim 1 : vector<8x256xf32>, i32 -> vector<8x256xf32>
    %c1_i32_14 = arith.constant 1 : i32
    %24 = tpu.dynamic_rotate %20 by %c1_i32_14 dim 1 : vector<8x256xf32>, i32 -> vector<8x256xf32>
    %c255_i32_15 = arith.constant 255 : i32
    %25 = tpu.dynamic_rotate %20 by %c255_i32_15 dim 1 : vector<8x256xf32>, i32 -> vector<8x256xf32>
    %c241_i32_16 = arith.constant 241 : i32
    %26 = tpu.dynamic_rotate %20 by %c241_i32_16 dim 1 : vector<8x256xf32>, i32 -> vector<8x256xf32>
    %c240_i32_17 = arith.constant 240 : i32
    %27 = tpu.dynamic_rotate %20 by %c240_i32_17 dim 1 : vector<8x256xf32>, i32 -> vector<8x256xf32>
    %c239_i32_18 = arith.constant 239 : i32
    %28 = tpu.dynamic_rotate %20 by %c239_i32_18 dim 1 : vector<8x256xf32>, i32 -> vector<8x256xf32>
    %29 = tpu.concatenate %21, %22, %23, %24, %20, %25, %26, %27, %28 in 0 : vector<8x256xf32>, vector<8x256xf32>, vector<8x256xf32>, vector<8x256xf32>, vector<8x256xf32>, vector<8x256xf32>, vector<8x256xf32>, vector<8x256xf32>, vector<8x256xf32> -> vector<72x256xf32>
    %30 = arith.mulf %29, %1 : vector<72x256xf32>
    %c0_19 = arith.constant 0 : index
    %c0_20 = arith.constant 0 : index
    %31 = vector.load %arg6[%c0_19, %c0_20] : memref<8x72xf32, #tpu.memory_space<vmem>>, vector<8x72xf32>
    %cst_21 = arith.constant dense<0.000000e+00> : vector<8x256xf32>
    %32 = tpu.matmul %31, %30, %cst_21 {dimension_numbers = #tpu.dot_dimension_numbers<[1], [0], [0], [1], [0, 0, 1, 1], [], []>} : vector<8x72xf32>, vector<72x256xf32>, vector<8x256xf32> -> vector<8x256xf32>
    %c0_22 = arith.constant 0 : index
    %c0_23 = arith.constant 0 : index
    %33 = vector.load %arg7[%c0_22, %c0_23] : memref<8x1xf32, #tpu.memory_space<vmem>>, vector<8x1xf32>
    %34 = vector.broadcast %33 : vector<8x1xf32> to vector<8x256xf32>
    %35 = arith.addf %32, %34 : vector<8x256xf32>
    %36 = vector.shape_cast %35 : vector<8x256xf32> to vector<1x8x256xf32>
    %cst_24 = arith.constant dense<0.000000e+00> : vector<1xf32>
    %37 = vector.multi_reduction <add>, %36, %cst_24 [1, 2] : vector<1x8x256xf32> to vector<1xf32>
    %38 = vector.shape_cast %37 : vector<1xf32> to vector<1x1x1xf32>
    %39 = vector.extract %38[0, 0, 0] : f32 from vector<1x1x1xf32>
    %cst_25 = arith.constant 4.8828125E-4 : f32
    %40 = arith.mulf %39, %cst_25 : f32
    %41 = arith.mulf %35, %35 : vector<8x256xf32>
    %42 = vector.shape_cast %41 : vector<8x256xf32> to vector<1x8x256xf32>
    %cst_26 = arith.constant dense<0.000000e+00> : vector<1xf32>
    %43 = vector.multi_reduction <add>, %42, %cst_26 [1, 2] : vector<1x8x256xf32> to vector<1xf32>
    %44 = vector.shape_cast %43 : vector<1xf32> to vector<1x1x1xf32>
    %45 = vector.extract %44[0, 0, 0] : f32 from vector<1x1x1xf32>
    %cst_27 = arith.constant 4.8828125E-4 : f32
    %46 = arith.mulf %45, %cst_27 : f32
    %47 = arith.mulf %40, %40 : f32
    %48 = arith.subf %46, %47 : f32
    %49 = vector.broadcast %40 : f32 to vector<8x256xf32>
    %50 = arith.subf %35, %49 : vector<8x256xf32>
    %cst_28 = arith.constant 9.99999974E-6 : f32
    %51 = arith.addf %48, %cst_28 : f32
    %52 = math.rsqrt %51 : f32
    %53 = vector.broadcast %52 : f32 to vector<8x256xf32>
    %54 = arith.mulf %50, %53 : vector<8x256xf32>
    %cst_29 = arith.constant 0.000000e+00 : f32
    %55 = vector.broadcast %cst_29 : f32 to vector<8x256xf32>
    %56 = arith.maximumf %54, %55 : vector<8x256xf32>
    %c0_30 = arith.constant 0 : index
    %c0_31 = arith.constant 0 : index
    %c0_32 = arith.constant 0 : index
    %57 = vector.load %arg8[%c0_30, %c0_31, %c0_32] : memref<1x8x256xf32, #tpu.memory_space<vmem>>, vector<1x8x256xf32>
    %58 = vector.shape_cast %57 : vector<1x8x256xf32> to vector<8x256xf32>
    %59 = vector.shape_cast %56 : vector<8x256xf32> to vector<1x8x256xf32>
    tpu.vector_store %arg8[%c0_30, %c0_31, %c0_32], %59 {strides = array<i32>} : memref<1x8x256xf32, #tpu.memory_space<vmem>>, vector<1x8x256xf32>,
    return
  }
  func.func @transform_0(%arg0: i32) -> (i32, i32, i32) {
    %c0_i32 = arith.constant 0 : i32
    %c0_i32_0 = arith.constant 0 : i32
    %c0_i32_1 = arith.constant 0 : i32
    return %arg0, %c0_i32, %c0_i32_0 : i32, i32, i32
  }
  func.func @transform_1(%arg0: i32) -> (i32, i32) {
    %c0_i32 = arith.constant 0 : i32
    %c0_i32_0 = arith.constant 0 : i32
    %c0_i32_1 = arith.constant 0 : i32
    return %c0_i32, %c0_i32_0 : i32, i32
  }
  func.func @transform_2(%arg0: i32) -> (i32, i32) {
    %c0_i32 = arith.constant 0 : i32
    %c0_i32_0 = arith.constant 0 : i32
    %c0_i32_1 = arith.constant 0 : i32
    return %c0_i32, %c0_i32_0 : i32, i32
  }
  func.func @transform_3(%arg0: i32) -> (i32, i32) {
    %c0_i32 = arith.constant 0 : i32
    %c0_i32_0 = arith.constant 0 : i32
    %c0_i32_1 = arith.constant 0 : i32
    return %c0_i32, %c0_i32_0 : i32, i32
  }
  func.func @transform_4(%arg0: i32) -> (i32, i32) {
    %c0_i32 = arith.constant 0 : i32
    %c0_i32_0 = arith.constant 0 : i32
    %c0_i32_1 = arith.constant 0 : i32
    return %c0_i32, %c0_i32_0 : i32, i32
  }
  func.func @transform_5(%arg0: i32) -> (i32, i32) {
    %c0_i32 = arith.constant 0 : i32
    %c0_i32_0 = arith.constant 0 : i32
    %c0_i32_1 = arith.constant 0 : i32
    return %c0_i32, %c0_i32_0 : i32, i32
  }
  func.func @transform_6(%arg0: i32) -> (i32, i32) {
    %c0_i32 = arith.constant 0 : i32
    %c0_i32_0 = arith.constant 0 : i32
    %c0_i32_1 = arith.constant 0 : i32
    return %c0_i32, %c0_i32_0 : i32, i32
  }
  func.func @transform_7(%arg0: i32) -> (i32, i32, i32) {
    %c0_i32 = arith.constant 0 : i32
    %c0_i32_0 = arith.constant 0 : i32
    %c0_i32_1 = arith.constant 0 : i32
    return %arg0, %c0_i32, %c0_i32_0 : i32, i32, i32
  }
}

</mosaic_0001>

<bundles_post_ra>
// kernel: tpu_custom_call.1
= control target key start
LH: loop header
LB: loop body
LE: loop exit
PB: predicated region body
PF: predicated region fallthrough
CT: control target
= control target key end

     0   :  { %s1468_s0 = inlined_call_operand.hbm [shape: f32[2,8,256], index: 0, kind: input, shape index: {}]   ;;  %s1469_s1 = inlined_call_operand.hbm [shape: f32[72,256], index: 1, kind: input, shape index: {}]   ;;  %s1470_s2 = inlined_call_operand.hbm [shape: f32[72,256], index: 2, kind: input, shape index: {}]   ;;  %s1471_s3 = inlined_call_operand.vmem [shape: f32[8,72], index: 3, kind: input, shape index: {}]   ;;  %s1472_s4 = inlined_call_operand.vmem [shape: f32[8,1], index: 4, kind: input, shape index: {}]   ;;  %s1473_s5 = inlined_call_operand.vmem [shape: f32[8,72], index: 5, kind: input, shape index: {}]   ;;  %s1474_s6 = inlined_call_operand.vmem [shape: f32[8,1], index: 6, kind: input, shape index: {}]   ;;  %s1475_s7 = inlined_call_operand.hbm [shape: f32[2,8,256], index: 7, kind: output, shape index: {}]  }
   0x1   :  { %1480 = sst [smem:[#allocation12_spill]] %s1469_s1 }
   0x2   :  { %1481 = sst [smem:[#allocation13_spill]] %s1470_s2 }
   0x3   :  { %12 = vsyncpa [#allocation3], 0 }
   0x4   :  { %14 = vsyncpa [#allocation3 + $0x1], 0 }
   0x5   :  { %15 = vsyncpa [#allocation6], 0 }
   0x6   :  { %16 = vsyncpa [#allocation4], 0 }
   0x7   :  { %18 = vsyncpa [#allocation4 + $0x1], 0  ;;  %s1129_s24 = smov 0   ;;  %s1131_s25 = smov 0  }
   0x8   :  { %s1133_s26 = smov 0   ;;  %s1135_s27 = smov 0  }
   0x9 LB: > { %s1150_s28 = sadd.s32 4294967295, %s1071_s27   ;;  %s813_s29 = sadd.s32 4294967294, %s1071_s27   ;;  %s1071_s27 = sphi %s1135_s27, %s1501_s27   ;;  %s1067_s26 = sphi %s1133_s26, %s1500_s26   ;;  %s1063_s25 = sphi %s1131_s25, %s1499_s25   ;;  %s1059_s24 = sphi %s1129_s24, %s1498_s24  }
   0xa   : > { %p44_p0 = scmp.ne.s32.totalorder %s1063_s25, %s1059_s24  ;;  %p1476_p1 = scmp.eq.s32.totalorder %s1150_s28, 0 }
   0xb   : > { %p200_p3 = scmp.eq.s32.totalorder %s813_s29, 1  ;;  %p814_p5 = scmp.ge.s32.totalorder %s1071_s27, 1 }
   0xc   : > { %p1159_p4 = por %p1476_p1, %p44_p0  ;;  %p207_p7 = scmp.lt.s32.totalorder %s1071_s27, 3 }
   0xd   : > { %p1164_p6 = por %p200_p3, %p44_p0  ;;  %s1073_s10 = smov [#allocation5]  }
   0xe   : > { %s1482_s30 = scalar_select %p1159_p4, 1, 0 }
   0xf   : > { %s1483_s8 = scalar_select %p1164_p6, 1, 0 }
  0x10   : > { %p1169_p8 = pnand %p814_p5, %p207_p7  ;;  %s219_s11 = sshll.u32 %s1073_s10, 4  ;;  %s220_s11 = int_to_ptr.vmem [resolvable:$true] %s219_s11 }
  0x11   : > { %s1074_s13 = smov [#allocation7]   ;;  %s934_s15 = scalar_lea.vmem %s220_s11, 2304 }
  0x12   : > { %s1484_s9 = scalar_select %p1169_p8, 1, 0 }
  0x13   : > { %p853_p9 = pneg %p1169_p8  ;;  %s232_s14 = sshll.u32 %s1074_s13, 4  ;;  %s233_s14 = int_to_ptr.vmem [resolvable:$true] %s232_s14 }
  0x14   : > { %p935_p13 = scmp.ne.s32.totalorder %s220_s11, %s934_s15  ;;  %p942_p5 = scmp.lt.s32.totalorder %s220_s11, %s220_s11 }
  0x15   : > { %p1178_p11 = pnand %p853_p9, %p1476_p1  ;;  %p943_p7 = scmp.lt.s32.totalorder %s934_s15, %s934_s15 }
  0x17   : > { %p925_p12 = pneg %p1178_p11  ;;  %p944_p10 = por %p943_p7, %p942_p5 }
  0x19   : > { %p937_p0 = pnand %p935_p13, %p925_p12 }
  0x1b   : > { %p938_p3 = pneg %p937_p0 }
  0x1d   : > { %p945_p9 = pnand %p944_p10, %p938_p3 }
  0x1f   : > { %948 = shalt.err (!%p945_p9)
}
  0x20   : > { %s1075_s16 = smov 256   ;;  %s1076_s17 = smov 16  }
  0x21   : > { %s1486_s1 = sld [smem:[#allocation12_spill]]  ;;  %s960_s20 = scalar_lea.vmem %s233_s14, 2304 }
  0x22   : > { %p961_p1 = scmp.ne.s32.totalorder %s233_s14, %s960_s20  ;;  %p968_p2 = scmp.lt.s32.totalorder %s233_s14, %s233_s14 }
  0x23   : > { %p969_p6 = scmp.lt.s32.totalorder %s960_s20, %s960_s20 }
  0x24   : > { %p963_p13 = pnand %p961_p1, %p925_p12 }
  0x25   : > { %p970_p5 = por %p969_p6, %p968_p2 }
  0x26   : > { %p964_p0 = pneg %p963_p13 }
  0x27   : > { %856 = dma.hbm_to_vmem [thread:$0]  (!%p1178_p11), %s1486_s1, 2304, %s220_s11, [#allocation6], %s1075_s16, %s1075_s16, %s1076_s17  }
  0x28   : > { %p971_p10 = pnand %p970_p5, %p964_p0 }
  0x2a   : > { %974 = shalt.err (!%p971_p10)
}
  0x2b   : > { %s1487_s2 = sld [smem:[#allocation13_spill]]  ;;  %s1201_s23 = sadd.s32 1, %s1071_s27  }
  0x2c   : > { %s31_s29 = sadd.s32 1, %s1067_s26  ;;  %s28_s10 = ssub.s32 %s1071_s27, %s1201_s23 }
  0x2d   : > { %p38_p1 = scmp.ne.s32.totalorder %s1067_s26, %s1063_s25  ;;  %p29_p2 = scmp.eq.s32.totalorder %s28_s10, 0 }
  0x2e   : > { %p39_p6 = scmp.eq.s32.totalorder %s1071_s27, 0  ;;  %p1488_p12 = scmp.eq.s32.totalorder %s1150_s28, 1 }
  0x2f   : > { %p870_p7 = scmp.lt.s32.totalorder %s1071_s27, 2  ;;  %s258_s13 = sand.u32 1, %s1067_s26  }
  0x30   : > { %p1211_p3 = por %p1488_p12, %p38_p1  ;;  %p40_p9 = por %p39_p6, %p38_p1 }
  0x31   : > { %859 = dma.hbm_to_vmem [thread:$0]  (!%p1178_p11), %s1487_s2, 2304, %s233_s14, [#allocation6], %s1075_s16, %s1075_s16, %s1076_s17  }
  0x32   : > { %s1489_s11 = scalar_select %p1211_p3, 1, 0 }
  0x33   : > { %s1217_s12 = scalar_select %p29_p2, %s1067_s26, %s31_s29  }
  0x34   : > { %s818_s15 = sshll.u32 %s258_s13, 4  ;;  %s833_s14 = sshll.u32 %s1071_s27, 8 }
  0x35   : > { %s1224_s18 = scalar_lea.hbm %s1468_s0, %s833_s14  ;;  %s262_s19 = scalar_lea.vmem [#allocation2], %s818_s15 }
  0x36   : > { %s270_s20 = sshll.u32 %s262_s19, 4  ;;  %p1226_p11 = pnand %p870_p7, %p40_p9  ;;  %s271_s20 = int_to_ptr.vmem [resolvable:$true] %s270_s20 }
  0x37   : > { %s259_s22 = scalar_lea.sflag [#allocation3], %s258_s13  ;;  %s975_s29 = scalar_lea.hbm %s1224_s18, 256 }
  0x38   : > { %p976_p13 = scmp.ne.s32.totalorder %s1224_s18, %s975_s29  ;;  %p977_p0 = pneg %p1226_p11 }
  0x39   : > { %s980_s16 = scalar_lea.hbm %s1468_s0, 512  ;;  %p981_p1 = scmp.lt.s32.totalorder %s1224_s18, %s1468_s0 }
  0x3a   : > { %p978_p5 = pnand %p977_p0, %p976_p13  ;;  %p982_p2 = scmp.lt.s32.totalorder %s980_s16, %s975_s29 }
  0x3c   : > { %p979_p10 = pneg %p978_p5  ;;  %p983_p6 = por %p982_p2, %p981_p1 }
  0x3e   : > { %p984_p12 = pnand %p983_p6, %p979_p10 }
  0x40   : > { %987 = shalt.err (!%p984_p12)
}
  0x41   : > { %s988_s19 = scalar_lea.vmem %s271_s20, 256  ;;  %s1077_s13 = smov [#allocation2]  }
  0x42   : > { %p989_p7 = scmp.ne.s32.totalorder %s271_s20, %s988_s19  ;;  %s993_s1 = sshll.u32 %s1077_s13, 4  ;;  %s994_s1 = int_to_ptr.vmem [resolvable:$false] %s993_s1 }
  0x43   : > { %s995_s2 = scalar_lea.vmem %s994_s1, 512  ;;  %p996_p13 = scmp.lt.s32.totalorder %s271_s20, %s994_s1 }
  0x44   : > { %p991_p9 = pnand %p989_p7, %p977_p0  ;;  %p997_p5 = scmp.lt.s32.totalorder %s995_s2, %s988_s19 }
  0x46   : > { %p992_p3 = pneg %p991_p9  ;;  %p998_p4 = por %p997_p5, %p996_p13 }
  0x48   : > { %p999_p8 = pnand %p998_p4, %p992_p3 }
  0x4a   : > { %1002 = shalt.err (!%p999_p8)
}
  0x4b   : > { %863 = dma.hbm_to_vmem [thread:$0]  (!%p1226_p11), %s1224_s18, 256, %s271_s20, %s259_s22  }
  0x4c   : > { %p1491_p10 = scmp.ne.s32.totalorder %s1484_s9, 0 }
  0x4d   : > { %s1247_s29 = sand.u32 (!%p1491_p10), 1, %s1063_s25   ;;  %p1492_p4 = scmp.ne.s32.totalorder (!%p1491_p10), %s1482_s30, 0 }
  0x4e   : > { %279 = sbr.rel (%p1491_p10) target bundleno = 1076 (0x434), region = 48  ;;  %s822_s10 = sshll.u32 (!%p1491_p10), %s1247_s29, 4 }
  0x4f   : > { %s282_s1 = scalar_lea.sflag (!%p1491_p10), [#allocation3], %s1247_s29  ;;  %s285_s2 = scalar_lea.vmem (!%p1491_p10), [#allocation2], %s822_s10 }
  0x53   : > { %1046 = dma.done.wait (%p1492_p4), %s282_s1, 256  }
  0x54   : > { %1048 = vsyncadd (%p1492_p4), %s282_s1, 4294967040  ;;  %p1493_p8 = scmp.eq.s32.totalorder %s1150_s28, 0 }
  0x56   : > { %1050 = dma.done.wait (%p1493_p8), [#allocation6], 4608   ;;  %p1494_p3 = pmov %p1493_p8 }
  0x57   : > { %v1261_v0 = vld [vmem:[%s285_s2] sm:$0xff]  ;;  %s1078_s9 = smov 112   ;;  %s1079_s18 = smov 111   ;;  %v1267_v1 = vld [vmem:[%s285_s2 + $0x8] sm:$0xff]  ;;  %v1083_v2 = vmov 0.0   ;;  %v1085_v3 = vmov 0   ;;  %v366_v5 = vlaneseq }
  0x58   : > { %1052 = vsyncadd (%p1494_p3), [#allocation6], 4294962688  ;;  %406 = vrot.lane.b32.xlu1 %v1261_v0, %s1078_s9  ;;  %413 = vrot.lane.b32.xlu0 %v1261_v0, %s1079_s18  ;;  %s1080_s30 = smov 113   ;;  %s1081_s20 = smov 127   ;;  %v439_v4 = vld [vmem:[%s1472_s4] sm:$0xff]  ;;  %v341_v9 = vld [vmem:[#allocation5 + $0x88] sm:$0xff] }
  0x59   : > { %s1082_s21 = smov 1   ;;  %513 = vmatprep.mubr.f32.mxu0 %v1083_v2  ;;  %662 = vmatprep.mubr.f32.mxu1 %v1083_v2  ;;  %s1084_s22 = smov 15   ;;  %v1300_v6 = vand.u32 127, %v366_v5  ;;  %v340_v10 = vld [vmem:[#allocation5 + $0x80] sm:$0xff]  ;;  %v339_v13 = vld [vmem:[#allocation5 + $0x78] sm:$0xff]  ;;  %v338_v17 = vld [vmem:[#allocation5 + $0x70] sm:$0xff] }
  0x5a   : > { %920 = vset.pattern.permute.xlu0 %v1085_v3  ;;  %s1086_s14 = smov 16   ;;  %s1087_s16 = smov 17   ;;  %v336_v21 = vld [vmem:[#allocation5 + $0x60] sm:$0xff]  ;;  %v337_v22 = vld [vmem:[#allocation5 + $0x68] sm:$0xff]  ;;  %v334_v31 = vld [vmem:[#allocation5 + $0x50] sm:$0xff]  ;;  %vm445_vm8 = vcmask 588800  }
  0x5b   : > { %vm410_vm0 = vcmp.lt.s32.totalorder %v1300_v6, 112  ;;  %vm417_vm1 = vcmp.lt.s32.totalorder %v1300_v6, 111  ;;  %vm403_vm2 = vcmp.lt.s32.totalorder %v1300_v6, 113  ;;  %vm396_vm3 = vcmp.lt.s32.totalorder %v1300_v6, 127  ;;  %v335_v32 = vld [vmem:[#allocation5 + $0x58] sm:$0xff]  ;;  %v333_v33 = vld [vmem:[#allocation5 + $0x48] sm:$0xff] }
  0x5c   : > { %408 = vrot.lane.b32.xlu1 %v1267_v1, %s1078_s9  ;;  %415 = vrot.lane.b32.xlu0 %v1267_v1, %s1079_s18  ;;  %v332_v36 = vld [vmem:[#allocation5 + $0x40] sm:$0xff]  ;;  %vm389_vm4 = vcmp.lt.s32.totalorder %v1300_v6, 1  ;;  %v429_v41 = vmul.f32 %v1267_v1, %v333_v33  ;;  %v330_v42 = vld [vmem:[#allocation5 + $0x30] sm:$0xff]  ;;  %v331_v43 = vld [vmem:[#allocation5 + $0x38] sm:$0xff]  ;;  %vm382_vm5 = vcmp.lt.s32.totalorder %v1300_v6, 15  ;;  %vm375_vm6 = vcmp.lt.s32.totalorder %v1300_v6, 16 }
  0x5d   : > { %v428_v44 = vmul.f32 %v1261_v0, %v332_v36  ;;  %v328_v51 = vld [vmem:[#allocation5 + $0x20] sm:$0xff]  ;;  %v329_v52 = vld [vmem:[#allocation5 + $0x28] sm:$0xff]  ;;  %v326_v59 = vld [vmem:[#allocation5 + $0x10] sm:$0xff]  ;;  %vm368_vm7 = vcmp.lt.s32.totalorder %v1300_v6, 17  ;;  %s834_s19 = sshll.u32 %s1150_s28, 8  ;;  %s323_s13 = scalar_lea.vmem [#allocation8], %s822_s10 }
  0x5e   : > { %v327_v60 = vld [vmem:[#allocation5 + $0x18] sm:$0xff]  ;;  %v324_v3 = vld [vmem:[#allocation5] sm:$0xff]  ;;  %s724_s1 = sshll.u32 %s323_s13, 4  ;;  %p1495_p0 = scmp.ne.s32.totalorder %s1489_s11, 0  ;;  %s725_s1 = int_to_ptr.vmem [resolvable:$true] %s724_s1 }
  0x5f   : > { %s1088_s28 = smov [#allocation8]  }
  0x60   : > { %401 = vrot.lane.b32.xlu1 %v1267_v1, %s1080_s30  ;;  %399 = vrot.lane.b32.xlu0 %v1261_v0, %s1080_s30  ;;  %s1007_s10 = sshll.u32 %s1088_s28, 4  ;;  %s1008_s10 = int_to_ptr.vmem [resolvable:$false] %s1007_s10 }
  0x61   : > { %p1010_p6 = scmp.lt.s32.totalorder %s725_s1, %s1008_s10 }
  0x64   : > { %394 = vrot.lane.b32.xlu1 %v1267_v1, %s1081_s20  ;;  %392 = vrot.lane.b32.xlu0 %v1261_v0, %s1081_s20 }
  0x68   : > { %387 = vrot.lane.b32.xlu1 %v1267_v1, %s1082_s21  ;;  %385 = vrot.lane.b32.xlu0 %v1261_v0, %s1082_s21 }
  0x6c   : > { %380 = vrot.lane.b32.xlu1 %v1267_v1, %s1084_s22  ;;  %378 = vrot.lane.b32.xlu0 %v1261_v0, %s1084_s22 }
  0x70   : > { %373 = vrot.lane.b32.xlu1 %v1267_v1, %s1086_s14  ;;  %371 = vrot.lane.b32.xlu0 %v1261_v0, %s1086_s14 }
  0x74   : > { %364 = vrot.lane.b32.xlu1 %v1267_v1, %s1087_s16  ;;  %362 = vrot.lane.b32.xlu0 %v1261_v0, %s1087_s16 }
  0x78   : > { %442 = vperm.xlu0 %920, %v439_v4   ;;  %v325_v4 = vld [vmem:[#allocation5 + $0x8] sm:$0xff] }
  0xca   : > { %v407_v7 = vpop.permute.xlu1 %406  ;;  %v414_v8 = vpop.permute.xlu0 %413 }
  0xce   : > { %v409_v11 = vpop.permute.xlu1 %408  ;;  %v416_v12 = vpop.permute.xlu0 %415 }
  0xcf   : > { %v412_v14 = vsel %vm410_vm0, %v409_v11, %v407_v7  ;;  %v418_v15 = vsel %vm417_vm1, %v414_v8, %v416_v12  ;;  %v419_v16 = vsel %vm417_vm1, %v416_v12, %v414_v8  ;;  %v411_v18 = vsel %vm410_vm0, %v407_v7, %v409_v11  ;;  %v438_v12 = vld [vmem:[%s1471_s3] sm:$0xff] }
  0xd0   : > { %v437_v19 = vmul.f32 %v419_v16, %v341_v9  ;;  %v436_v20 = vmul.f32 %v418_v15, %v340_v10  ;;  %v435_v23 = vmul.f32 %v412_v14, %v339_v13  ;;  %v434_v26 = vmul.f32 %v411_v18, %v338_v17 }
  0xd2   : > { %v402_v24 = vpop.permute.xlu1 %401  ;;  %v400_v25 = vpop.permute.xlu0 %399  ;;  %463 = vmatprep.subr.mxu0 %v437_v19 }
  0xd3   : > { %v404_v27 = vsel %vm403_vm2, %v400_v25, %v402_v24  ;;  %v405_v28 = vsel %vm403_vm2, %v402_v24, %v400_v25  ;;  %464 = vmatpush1.msra.mxu0 %v436_v20  ;;  %v589_v20 = vld [vmem:[%s1474_s6] sm:$0xff]  ;;  %v358_v24 = vld [vmem:[#allocation7 + $0x80] sm:$0xff] }
  0xd4   : > { %v432_v29 = vmul.f32 %v404_v27, %v336_v21  ;;  %v433_v30 = vmul.f32 %v405_v28, %v337_v22  ;;  %465 = vmatprep.subr.mxu0 %v435_v23  ;;  %v359_v23 = vld [vmem:[#allocation7 + $0x88] sm:$0xff] }
  0xd5   : > { %466 = vmatpush1.msra.mxu0 %v434_v26 }
  0xd6   : > { %v395_v34 = vpop.permute.xlu1 %394  ;;  %v393_v35 = vpop.permute.xlu0 %392  ;;  %467 = vmatprep.subr.mxu0 %v433_v30 }
  0xd7   : > { %v397_v37 = vsel %vm396_vm3, %v393_v35, %v395_v34  ;;  %v398_v38 = vsel %vm396_vm3, %v395_v34, %v393_v35  ;;  %468 = vmatpush1.msra.mxu0 %v432_v29 }
  0xd8   : > { %v430_v39 = vmul.f32 %v397_v37, %v334_v31  ;;  %v431_v40 = vmul.f32 %v398_v38, %v335_v32  ;;  %v356_v31 = vld [vmem:[#allocation7 + $0x70] sm:$0xff]  ;;  %v357_v32 = vld [vmem:[#allocation7 + $0x78] sm:$0xff] }
  0xda   : > { %v388_v45 = vpop.permute.xlu1 %387  ;;  %v386_v46 = vpop.permute.xlu0 %385  ;;  %469 = vmatprep.subr.mxu0 %v431_v40  ;;  %v355_v40 = vld [vmem:[#allocation7 + $0x68] sm:$0xff] }
  0xdb   : > { %v390_v47 = vsel %vm389_vm4, %v386_v46, %v388_v45  ;;  %v391_v48 = vsel %vm389_vm4, %v388_v45, %v386_v46  ;;  %470 = vmatpush1.msra.mxu0 %v430_v39  ;;  %v354_v39 = vld [vmem:[#allocation7 + $0x60] sm:$0xff] }
  0xdc   : > { %v426_v49 = vmul.f32 %v391_v48, %v330_v42  ;;  %v427_v50 = vmul.f32 %v390_v47, %v331_v43  ;;  %471 = vmatprep.subr.mxu0 %v429_v41  ;;  %v352_v47 = vld [vmem:[#allocation7 + $0x50] sm:$0xff]  ;;  %v353_v48 = vld [vmem:[#allocation7 + $0x58] sm:$0xff] }
  0xdd   : > { %472 = vmatpush1.msra.mxu0 %v428_v44 }
  0xde   : > { %v381_v53 = vpop.permute.xlu1 %380  ;;  %v379_v54 = vpop.permute.xlu0 %378  ;;  %473 = vmatprep.subr.mxu0 %v427_v50 }
  0xdf   : > { %v383_v55 = vsel %vm382_vm5, %v379_v54, %v381_v53  ;;  %v384_v56 = vsel %vm382_vm5, %v381_v53, %v379_v54  ;;  %474 = vmatpush1.msra.mxu0 %v426_v49 }
  0xe0   : > { %v424_v57 = vmul.f32 %v384_v56, %v328_v51  ;;  %v425_v58 = vmul.f32 %v383_v55, %v329_v52  ;;  %v351_v52 = vld [vmem:[#allocation7 + $0x48] sm:$0xff]  ;;  %v350_v55 = vld [vmem:[#allocation7 + $0x40] sm:$0xff]  ;;  %v348_v56 = vld [vmem:[#allocation7 + $0x30] sm:$0xff] }
  0xe2   : > { %v374_v61 = vpop.permute.xlu1 %373  ;;  %v372_v62 = vpop.permute.xlu0 %371  ;;  %475 = vmatprep.subr.mxu0 %v425_v58 }
  0xe3   : > { %v376_v63 = vsel %vm375_vm6, %v372_v62, %v374_v61  ;;  %v377_v0 = vsel %vm375_vm6, %v374_v61, %v372_v62  ;;  %476 = vmatpush1.msra.mxu0 %v424_v57  ;;  %v349_v57 = vld [vmem:[#allocation7 + $0x38] sm:$0xff] }
  0xe4   : > { %v422_v1 = vmul.f32 %v377_v0, %v326_v59  ;;  %v423_v2 = vmul.f32 %v376_v63, %v327_v60 }
  0xe6   : > { %v365_v5 = vpop.permute.xlu1 %364  ;;  %v363_v7 = vpop.permute.xlu0 %362  ;;  %477 = vmatprep.subr.mxu0 %v423_v2  ;;  %v346_v2 = vld [vmem:[#allocation7 + $0x20] sm:$0xff] }
  0xe7   : > { %v369_v8 = vsel %vm368_vm7, %v363_v7, %v365_v5  ;;  %v370_v9 = vsel %vm368_vm7, %v365_v5, %v363_v7  ;;  %478 = vmatpush1.msra.mxu0 %v422_v1 }
  0xe8   : > { %v420_v10 = vmul.f32 %v370_v9, %v324_v3  ;;  %v421_v11 = vmul.f32 %v369_v8, %v325_v4  ;;  %v347_v3 = vld [vmem:[#allocation7 + $0x28] sm:$0xff] }
  0xea   : > { %479 = vmatprep.subr.mxu0 %v421_v11  ;;  %v344_v11 = vld [vmem:[#allocation7 + $0x10] sm:$0xff] }
  0xeb   : > { %480 = vmatpush1.msra.mxu0 %v420_v10 }
  0xec   : > { %826 = vmatmul.mubr.msk.f32.vlgmr.msra.gmra.mxu0 %vm445_vm8, %v438_v12  ;;  %v345_v12 = vld [vmem:[#allocation7 + $0x18] sm:$0xff] }
  0xf3   : > { %v443_v13 = vpop.permute.xlu0 %442 }
 0x1ac   : > { %v515_v14 = vpop.f32.mrf.mxu0 }
 0x1ad   : > { %v516_v15 = vadd.f32 %v515_v14, %v443_v13 }
 0x1ae   : > { %v517_v16 = vpop.f32.mrf.mxu0 }
 0x1af   : > { %v1348_v17 = vmax.f32 %v516_v15, 0.0  ;;  %v518_v18 = vadd.f32 %v517_v16, %v443_v13 }
 0x1b1   : > { %558 = vrot.lane.b32.xlu0 %v1348_v17, %s1078_s9  ;;  %564 = vrot.lane.b32.xlu1 %v1348_v17, %s1079_s18  ;;  %v1354_v19 = vmax.f32 %v518_v18, 0.0  ;;  %v578_v63 = vmul.f32 %v1348_v17, %v350_v55  ;;  %v342_v18 = vld [vmem:[#allocation7] sm:$0xff] }
 0x1b3   : > { %v579_v60 = vmul.f32 %v1354_v19, %v351_v52 }
 0x1b5   : > { %552 = vrot.lane.b32.xlu0 %v1348_v17, %s1080_s30  ;;  %566 = vrot.lane.b32.xlu1 %v1354_v19, %s1079_s18  ;;  %s1431_s18 = scalar_lea.hbm %s1475_s7, %s834_s19 }
 0x1b9   : > { %546 = vrot.lane.b32.xlu0 %v1348_v17, %s1081_s20  ;;  %560 = vrot.lane.b32.xlu1 %v1354_v19, %s1078_s9 }
 0x1bd   : > { %540 = vrot.lane.b32.xlu0 %v1348_v17, %s1082_s21  ;;  %554 = vrot.lane.b32.xlu1 %v1354_v19, %s1080_s30 }
 0x1c1   : > { %534 = vrot.lane.b32.xlu0 %v1348_v17, %s1084_s22  ;;  %548 = vrot.lane.b32.xlu1 %v1354_v19, %s1081_s20 }
 0x1c5   : > { %528 = vrot.lane.b32.xlu0 %v1348_v17, %s1086_s14  ;;  %542 = vrot.lane.b32.xlu1 %v1354_v19, %s1082_s21 }
 0x1c9   : > { %522 = vrot.lane.b32.xlu0 %v1348_v17, %s1087_s16  ;;  %536 = vrot.lane.b32.xlu1 %v1354_v19, %s1084_s22 }
 0x1cd   : > { %592 = vperm.xlu0 %920, %v589_v20   ;;  %530 = vrot.lane.b32.xlu1 %v1354_v19, %s1086_s14 }
 0x1d1   : > { %524 = vrot.lane.b32.xlu1 %v1354_v19, %s1087_s16  ;;  %v343_v19 = vld [vmem:[#allocation7 + $0x8] sm:$0xff] }
 0x223   : > { %v559_v21 = vpop.permute.xlu0 %558  ;;  %v565_v22 = vpop.permute.xlu1 %564 }
 0x227   : > { %v553_v25 = vpop.permute.xlu0 %552  ;;  %v567_v26 = vpop.permute.xlu1 %566 }
 0x228   : > { %v568_v27 = vsel %vm417_vm1, %v565_v22, %v567_v26  ;;  %v569_v28 = vsel %vm417_vm1, %v567_v26, %v565_v22  ;;  %v588_v26 = vld [vmem:[%s1473_s5] sm:$0xff] }
 0x229   : > { %v587_v29 = vmul.f32 %v569_v28, %v359_v23  ;;  %v586_v30 = vmul.f32 %v568_v27, %v358_v24 }
 0x22b   : > { %v547_v33 = vpop.permute.xlu0 %546  ;;  %612 = vmatprep.subr.mxu1 %v587_v29  ;;  %v561_v34 = vpop.permute.xlu1 %560 }
 0x22c   : > { %v562_v35 = vsel %vm410_vm0, %v559_v21, %v561_v34  ;;  %v563_v36 = vsel %vm410_vm0, %v561_v34, %v559_v21  ;;  %613 = vmatpush1.msra.mxu1 %v586_v30 }
 0x22d   : > { %v584_v37 = vmul.f32 %v562_v35, %v356_v31  ;;  %v585_v38 = vmul.f32 %v563_v36, %v357_v32 }
 0x22f   : > { %614 = vmatprep.subr.mxu1 %v585_v38  ;;  %v555_v41 = vpop.permute.xlu1 %554  ;;  %v541_v44 = vpop.permute.xlu0 %540 }
 0x230   : > { %v556_v42 = vsel %vm403_vm2, %v553_v25, %v555_v41  ;;  %v557_v43 = vsel %vm403_vm2, %v555_v41, %v553_v25  ;;  %615 = vmatpush1.msra.mxu1 %v584_v37 }
 0x231   : > { %v582_v45 = vmul.f32 %v556_v42, %v354_v39  ;;  %v583_v46 = vmul.f32 %v557_v43, %v355_v40 }
 0x233   : > { %616 = vmatprep.subr.mxu1 %v583_v46  ;;  %v549_v49 = vpop.permute.xlu1 %548  ;;  %v535_v58 = vpop.permute.xlu0 %534 }
 0x234   : > { %v550_v50 = vsel %vm396_vm3, %v547_v33, %v549_v49  ;;  %v551_v51 = vsel %vm396_vm3, %v549_v49, %v547_v33  ;;  %617 = vmatpush1.msra.mxu1 %v582_v45 }
 0x235   : > { %v580_v53 = vmul.f32 %v550_v50, %v352_v47  ;;  %v581_v54 = vmul.f32 %v551_v51, %v353_v48 }
 0x237   : > { %618 = vmatprep.subr.mxu1 %v581_v54  ;;  %v543_v59 = vpop.permute.xlu1 %542  ;;  %v529_v8 = vpop.permute.xlu0 %528 }
 0x238   : > { %v544_v61 = vsel %vm389_vm4, %v541_v44, %v543_v59  ;;  %v545_v62 = vsel %vm389_vm4, %v543_v59, %v541_v44  ;;  %619 = vmatpush1.msra.mxu1 %v580_v53 }
 0x239   : > { %v576_v0 = vmul.f32 %v545_v62, %v348_v56  ;;  %v577_v1 = vmul.f32 %v544_v61, %v349_v57  ;;  %620 = vmatprep.subr.mxu1 %v579_v60 }
 0x23a   : > { %621 = vmatpush1.msra.mxu1 %v578_v63 }
 0x23b   : > { %v537_v4 = vpop.permute.xlu1 %536  ;;  %622 = vmatprep.subr.mxu1 %v577_v1  ;;  %v523_v20 = vpop.permute.xlu0 %522 }
 0x23c   : > { %v538_v5 = vsel %vm382_vm5, %v535_v58, %v537_v4  ;;  %v539_v7 = vsel %vm382_vm5, %v537_v4, %v535_v58  ;;  %623 = vmatpush1.msra.mxu1 %v576_v0 }
 0x23d   : > { %v574_v9 = vmul.f32 %v539_v7, %v346_v2  ;;  %v575_v10 = vmul.f32 %v538_v5, %v347_v3 }
 0x23f   : > { %v531_v13 = vpop.permute.xlu1 %530  ;;  %624 = vmatprep.subr.mxu1 %v575_v10 }
 0x240   : > { %v532_v14 = vsel %vm375_vm6, %v529_v8, %v531_v13  ;;  %v533_v15 = vsel %vm375_vm6, %v531_v13, %v529_v8  ;;  %625 = vmatpush1.msra.mxu1 %v574_v9 }
 0x241   : > { %v572_v16 = vmul.f32 %v533_v15, %v344_v11  ;;  %v573_v17 = vmul.f32 %v532_v14, %v345_v12 }
 0x243   : > { %v525_v21 = vpop.permute.xlu1 %524  ;;  %626 = vmatprep.subr.mxu1 %v573_v17 }
 0x244   : > { %v526_v22 = vsel %vm368_vm7, %v523_v20, %v525_v21  ;;  %v527_v23 = vsel %vm368_vm7, %v525_v21, %v523_v20  ;;  %627 = vmatpush1.msra.mxu1 %v572_v16 }
 0x245   : > { %v570_v24 = vmul.f32 %v527_v23, %v342_v18  ;;  %v571_v25 = vmul.f32 %v526_v22, %v343_v19 }
 0x247   : > { %628 = vmatprep.subr.mxu1 %v571_v25 }
 0x248   : > { %629 = vmatpush1.msra.mxu1 %v570_v24  ;;  %v593_v27 = vpop.permute.xlu0 %592 }
 0x249   : > { %827 = vmatmul.mubr.msk.f32.vlgmr.msra.gmra.mxu1 %vm445_vm8, %v588_v26 }
 0x309   : > { %v664_v28 = vpop.f32.mrf.mxu1 }
 0x30a   : > { %v665_v29 = vadd.f32 %v664_v28, %v593_v27 }
 0x30b   : > { %v666_v30 = vpop.f32.mrf.mxu1 }
 0x30c   : > { %v667_v31 = vadd.f32 %v666_v30, %v593_v27  ;;  %v680_v33 = vmul.f32 %v665_v29, %v665_v29 }
 0x30e   : > { %v669_v32 = vadd.f32 %v667_v31, %v665_v29  ;;  %v681_v6 = vmul.f32 %v667_v31, %v667_v31 }
 0x310   : > { %670 = vadd.xlane.f32.xlu1 %v669_v32  ;;  %v682_v34 = vadd.f32 %v681_v6, %v680_v33 }
 0x312   : > { %683 = vadd.xlane.f32.xlu0 %v682_v34 }
 0x399   : > { %v671_v35 = vpop.xlane.xlu1 %670 }
 0x39a   : > { %v672_v36 = vrot.slane %v671_v35, 4 }
 0x39b   : > { %v684_v37 = vpop.xlane.xlu0 %683 }
 0x39c   : > { %v673_v38 = vadd.f32 %v672_v36, %v671_v35  ;;  %v685_v39 = vrot.slane %v684_v37, 4 }
 0x39e   : > { %v674_v40 = vrot.slane %v673_v38, 2  ;;  %v686_v41 = vadd.f32 %v685_v39, %v684_v37 }
 0x3a0   : > { %v687_v42 = vrot.slane %v686_v41, 2  ;;  %v675_v43 = vadd.f32 %v674_v40, %v673_v38 }
 0x3a2   : > { %v688_v44 = vadd.f32 %v687_v42, %v686_v41  ;;  %v676_v45 = vrot.slane %v675_v43, 1 }
 0x3a4   : > { %v677_v46 = vadd.f32 %v676_v45, %v675_v43  ;;  %v689_v47 = vrot.slane %v688_v44, 1 }
 0x3a6   : > { %835 = vpush %v677_v46  ;;  %v690_v48 = vadd.f32 %v689_v47, %v688_v44 }
 0x3a8   : > { %837 = vpush %v690_v48 }
 0x3d7   : > { %s836_s30 = spop %835 }
 0x3d8   : > { %s679_s20 = smul.f32 0.00048828125, %s836_s30  ;;  %s710_s30 = scalar_lea.sflag [#allocation4], %s1247_s29 }
 0x3d9   : > { %s838_s21 = spop %837 }
 0x3da   : > { %s693_s22 = smul.f32 %s679_s20, %s679_s20  ;;  %v695_v51 = vstv %s679_s20  ;;  %s1003_s20 = scalar_lea.vmem %s725_s1, 256 }
 0x3db   : > { %s692_s14 = smul.f32 0.00048828125, %s838_s21  ;;  %v696_v52 = vsub.f32 %v665_v29, %v695_v51  ;;  %v697_v53 = vsub.f32 %v667_v31, %v695_v51  ;;  %p1004_p11 = scmp.ne.s32.totalorder %s725_s1, %s1003_s20 }
 0x3dc   : > { %s1009_s21 = scalar_lea.vmem %s1008_s10, 512 }
 0x3dd   : > { %s694_s16 = ssub.f32 %s692_s14, %s693_s22  ;;  %p1005_p1 = pnand %p1004_p11, %p1495_p0 }
 0x3de   : > { %p1011_p12 = scmp.lt.s32.totalorder %s1009_s21, %s1003_s20 }
 0x3df   : > { %s698_s17 = sadd.f32 1e-05, %s694_s16  ;;  %p1006_p2 = pneg %p1005_p1 }
 0x3e0   : > { %p1012_p7 = por %p1011_p12, %p1010_p6 }
 0x3e1   : > { %v699_v49 = vstv %s698_s17 }
 0x3e2   : > { %921 = vrsqrt.f32 %v699_v49  ;;  %p1013_p9 = pnand %p1012_p7, %p1006_p2 }
 0x3ef   : > { %v922_v50 = vpop.eup %921 }
 0x3f0   : > { %839 = vpush %v922_v50 }
 0x421   : > { %s840_s15 = spop %839 }
 0x422   : > { %v702_v54 = vstv %s840_s15 }
 0x423   : > { %v703_v55 = vmul.f32 %v702_v54, %v696_v52  ;;  %v704_v56 = vmul.f32 %v702_v54, %v697_v53 }
 0x425   : > { %v705_v57 = vmax.f32 %v703_v55, 0.0  ;;  %v706_v58 = vmax.f32 %v704_v56, 0.0 }
 0x427   : > { %707 = vst [vmem:[%s323_s13] sm:$0xff] %v705_v57  ;;  %708 = vst [vmem:[%s323_s13 + $0x8] sm:$0xff] %v706_v58 }
 0x428   : > { %1016 = shalt.err (!%p1013_p9)
}
 0x429   : > { %s1017_s22 = scalar_lea.hbm %s1431_s18, 256  ;;  %s1021_s16 = scalar_lea.hbm %s1475_s7, 512 }
 0x42a   : > { %p1018_p13 = scmp.ne.s32.totalorder %s1431_s18, %s1017_s22  ;;  %p1022_p4 = scmp.lt.s32.totalorder %s1431_s18, %s1475_s7 }
 0x42b   : > { %p1023_p8 = scmp.lt.s32.totalorder %s1021_s16, %s1017_s22 }
 0x42c   : > { %p1019_p5 = pnand %p1018_p13, %p1495_p0 }
 0x42d   : > { %p1024_p3 = por %p1023_p8, %p1022_p4 }
 0x42e   : > { %p1020_p10 = pneg %p1019_p5 }
 0x430   : > { %p1025_p11 = pnand %p1024_p3, %p1020_p10 }
 0x432   : > { %1028 = shalt.err (!%p1025_p11)
}
 0x433   : > { %851 = dma.vmem_to_hbm [thread:$0]  (%p1495_p0), %s725_s1, 256, %s1431_s18, %s710_s30  }
 0x434 PF: > { %s736_s19 = sand.u32 1, %s1059_s24   ;;  %p1496_p1 = scmp.ne.s32.totalorder %s1483_s8, 0 }
 0x435   : > { %p1497_p2 = scmp.ge.s32.totalorder %s1071_s27, 2  ;;  %s737_s13 = scalar_lea.sflag [#allocation4], %s736_s19 }
 0x437   : > { %p865_p6 = pnand %p1497_p2, %p1496_p1 }
 0x439   : > { %p866_p12 = pneg %p865_p6 }
 0x43b   : > { %1054 = dma.done.wait (%p866_p12), %s737_s13, 256  }
 0x43c   : > { %1056 = vsyncadd (%p866_p12), %s737_s13, 4294967040  ;;  %p21_p7 = scmp.ge.s32.totalorder %s1201_s23, 4   ;;  %s1498_s24 = smov %s1063_s25 }
 0x43d   : > { %s1499_s25 = smov %s1067_s26  ;;  %s1500_s26 = smov %s1217_s12 }
 0x43e   : > { %s1501_s27 = smov %s1201_s23  ;;  %23 = sbr.rel (!%p21_p7) target bundleno = 9 (0x9), region = 101 }
 0x443   :  { %742 = vsyncpa [#allocation3], 1 }
 0x444   :  { %744 = vsyncpa [#allocation3 + $0x1], 1 }
 0x445   :  { %745 = vsyncpa [#allocation6], 1 }
 0x446   :  { %746 = vsyncpa [#allocation4], 1 }
 0x447   :  { %748 = vsyncpa [#allocation4 + $0x1], 1 }

</bundles_post_ra>
